<compile_context>
chip_gen: v6e
topology: v6e:2x2x1
jax: 0.10.0
libtpu: 0.0.40
codegen_flags: <defaults>
</compile_context>

<pallas_src>
import functools

import jax
import jax.numpy as jnp
from jax.experimental import pallas as pl
from jax.experimental.pallas import tpu as pltpu


def _leaky_relu(v):
    return jnp.where(v > 0, v, 0.01 * v)


def graphconv_kernel(adj_ref, ws_ref, wd_ref, x_ref, f_ref, o_ref, *,
                     bt, c, d, mxu_dtype):
    """One grid step = `bt` batch elements packed along the lane axis.

    adj_ref: (N, N)      static adjacency (grid-invariant)
    ws_ref : (C, C)      static_weight.weight  (used un-transposed, as in torch)
    wd_ref : (C, C)      dynamic_weight.weight (used un-transposed)
    x_ref  : (N, bt*C)   node features, batches packed along lanes
    f_ref  : (N, bt*D)   similarity features, batches packed along lanes
    o_ref  : (N, bt*C)   output slab, batches packed along lanes
    """
    # Grid-invariant operands: cast once for the MXU (accumulation stays f32).
    adj = adj_ref[...].astype(mxu_dtype)
    ws = ws_ref[...].astype(mxu_dtype)
    wd = wd_ref[...].astype(mxu_dtype)

    # Batch-invariant static aggregation for the WHOLE batch tile in a single
    # lane-dense MXU pass: adj @ [x_0 | x_1 | ...].
    x_all = x_ref[...].astype(mxu_dtype)                                # (N, bt*C)
    sx_all = jnp.dot(adj, x_all, preferred_element_type=jnp.float32)   # (N, bt*C)

    # Small static batch-tile loop; each iteration's result is stored directly
    # into the output slab so nothing stays live across iterations.  (bt is
    # kept small by the wrapper's tile selection, so unrolling is cheap.)
    for b in range(bt):
        lo = b * c
        xc = x_all[:, lo:lo + c]                                        # (N, C) mxu dtype
        sxc = sx_all[:, lo:lo + c]                                      # (N, C) f32

        # ---- static branch: (adj @ x_b) @ W_static ----
        s = jnp.dot(sxc.astype(mxu_dtype), ws,
                    preferred_element_type=jnp.float32)                 # (N, C)

        # ---- dynamic adjacency scores: f_b @ f_b^T ----
        # Contraction on the last dim of both operands (no explicit transpose /
        # XLU pass).  Kept in f32: the scores feed exp(), which amplifies bf16
        # rounding.  (bf16 scores/exp is a large-N v6e/v7x-only tweak.)
        fb = f_ref[:, b * d:(b + 1) * d]                                # (N, D) f32
        scores = jax.lax.dot_general(
            fb, fb, dimension_numbers=(((1,), (1,)), ((), ())),
            preferred_element_type=jnp.float32)                         # (N, N)
        scores = scores - jnp.max(scores, axis=-1, keepdims=True)
        e = jnp.exp(scores)                                             # (N, N) f32
        denom = jnp.sum(e, axis=-1, keepdims=True)                      # (N, 1)

        # ---- dynamic branch: softmax normalization folded AFTER e @ x ----
        # diag(1/denom) . (e @ x) . W  ==  (softmax(scores) @ x) . W, but the
        # reciprocal scaling touches an (N, C) tile instead of (N, N).
        dx = jnp.dot(e.astype(mxu_dtype), xc,
                     preferred_element_type=jnp.float32)                # (N, C)
        dx = dx * pl.reciprocal(denom, approx=True)                     # EUP slot
        dd = jnp.dot(dx.astype(mxu_dtype), wd,
                     preferred_element_type=jnp.float32)                # (N, C)

        # Direct slab store (no concatenate epilogue).
        o_ref[:, lo:lo + c] = (_leaky_relu(s) + _leaky_relu(dd)).astype(o_ref.dtype)


def _const_spec(shape, single_buffer):
    """BlockSpec for a grid-invariant 2-D operand.  When supported, request a
    single VMEM buffer (no point double-buffering a block whose index_map is
    constant); halves the resident footprint of adj / weights."""
    if single_buffer:
        return pl.BlockSpec(shape, lambda *_: (0, 0),
                            pipeline_mode=pl.Buffered(1))
    return pl.BlockSpec(shape, lambda *_: (0, 0))


def _vmem_limit_bytes():
    """~85% of this chip's physical VMEM (v5e/v6e: 128 MiB -> ~108 MiB,
    v7x: 64 MiB -> ~54 MiB).  Falls back to the compiler default (None) if the
    hardware query is unavailable."""
    try:
        cap = pltpu.get_tpu_info().vmem_capacity_bytes
        return int(cap * 0.85)
    except Exception:
        return None


def _default_batch_tile(B, C, D):
    """Smallest batch tile whose packed lane extent is 128-aligned and >= 512
    lanes: amortizes the ~0.35us per-grid-step overhead, keeps per-step VMEM /
    live ranges bounded, and leaves >= 2 grid steps so v7x's two TensorCores
    both get work.  Falls back to the whole batch if no such tile exists."""
    for want in (512, 128):
        for bt in range(1, B):
            if B % bt:
                continue
            if (bt * C) % 128 or (bt * D) % 128:
                continue
            if bt * C < want or bt * D < want:
                continue
            return bt
    return B


def graph_conv(x, features, static_adj, w_static, w_dynamic, *,
               bt=None, mxu_dtype=jnp.bfloat16):
    """x: (B, N, C), features: (B, N, D), static_adj: (N, N),
    w_static / w_dynamic: (C, C) torch Linear weights (used un-transposed)."""
    B, N, C = x.shape
    Bf, Nf, D = features.shape
    assert (Bf, Nf) == (B, N)
    assert static_adj.shape == (N, N)
    # The module does `... @ linear.weight` (NOT weight.T), so out_features
    # must equal in_features; the Linear biases are never used.
    assert w_static.shape == (C, C) and w_dynamic.shape == (C, C), (
        "weight is used un-transposed => in_features must equal out_features")

    cp_kwargs = dict(dimension_semantics=("parallel",))
    vmem_limit = _vmem_limit_bytes()
    if vmem_limit is not None:
        cp_kwargs["vmem_limit_bytes"] = vmem_limit
    compiler_params = pltpu.CompilerParams(**cp_kwargs)

    # Lane packing only pays when C / D are narrower than a vreg lane extent;
    # otherwise the pack/unpack transposes are 3 extra HBM round trips.
    packed = (C < 128) or (D < 128)

    if packed:
        if bt is None:
            bt = _default_batch_tile(B, C, D)
        assert B % bt == 0, "batch must divide evenly into batch tiles"
        assert bt == B or ((bt * C) % 128 == 0 and (bt * D) % 128 == 0), (
            "pick bt == B or a lane-aligned (multiple-of-128-lanes) batch tile")
        # Pack batch along lanes: (B, N, C) -> (N, B*C).
        # (Could alternatively try allow_input_fusion=[3, 4] to fuse these
        #  transposes into the pallas_call operands.)
        x_in = jnp.transpose(x, (1, 0, 2)).reshape(N, B * C)
        f_in = jnp.transpose(features, (1, 0, 2)).reshape(N, B * D)
        grid = (B // bt,)
        x_spec = pl.BlockSpec((N, bt * C), lambda i: (0, i))
        f_spec = pl.BlockSpec((N, bt * D), lambda i: (0, i))
        o_spec = pl.BlockSpec((N, bt * C), lambda i: (0, i))
        out_shape = jax.ShapeDtypeStruct((N, B * C), x.dtype)
        bt_eff = bt
    else:
        # Native layout: one batch element per grid step, squeezed leading dim.
        x_in, f_in = x, features
        grid = (B,)
        x_spec = pl.BlockSpec((None, N, C), lambda b: (b, 0, 0))
        f_spec = pl.BlockSpec((None, N, D), lambda b: (b, 0, 0))
        o_spec = pl.BlockSpec((None, N, C), lambda b: (b, 0, 0))
        out_shape = jax.ShapeDtypeStruct((B, N, C), x.dtype)
        bt_eff = 1

    kernel = functools.partial(graphconv_kernel, bt=bt_eff, c=C, d=D,
                               mxu_dtype=mxu_dtype)

    def run(single_buffer_consts):
        in_specs = [
            _const_spec((N, N), single_buffer_consts),   # static_adj
            _const_spec((C, C), single_buffer_consts),   # W_static
            _const_spec((C, C), single_buffer_consts),   # W_dynamic
            x_spec,
            f_spec,
        ]
        return pl.pallas_call(
            kernel,
            out_shape=out_shape,
            grid_spec=pltpu.PrefetchScalarGridSpec(
                num_scalar_prefetch=0,
                grid=grid,
                in_specs=in_specs,
                out_specs=o_spec),
            compiler_params=compiler_params,
        )(static_adj, w_static, w_dynamic, x_in, f_in)

    try:
        out_raw = run(True)
    except Exception:
        # pipeline_mode=pl.Buffered(1) not supported by this jax/Mosaic build:
        # fall back to default (double-buffered) constant operands.
        out_raw = run(False)

    if packed:
        return jnp.transpose(out_raw.reshape(N, B, C), (1, 0, 2))
    return out_raw


def graph_conv_reference(x, features, static_adj, w_static, w_dynamic):
    static_out = jax.nn.leaky_relu(
        jnp.matmul(static_adj, x) @ w_static, negative_slope=0.01)
    dyn_adj = jax.nn.softmax(
        jnp.matmul(features, jnp.swapaxes(features, -1, -2)), axis=-1)
    dynamic_out = jax.nn.leaky_relu(
        jnp.matmul(dyn_adj, x) @ w_dynamic, negative_slope=0.01)
    return static_out + dynamic_out


if __name__ == "__main__":
    # Small shapes: batch=2, num_nodes=16, in_features=out_features=32,
    # feature dim for the dynamic adjacency = 32.
    B, N, C, D = 2, 16, 32, 32

    key = jax.random.PRNGKey(0)
    kx, kf, kws, kwd = jax.random.split(key, 4)

    x = jax.random.normal(kx, (B, N, C), dtype=jnp.float32)
    features = jax.random.normal(kf, (B, N, D), dtype=jnp.float32)

    # Parameters (deterministic, synthetic): static_adj = 0.1 like the module;
    # Linear weights ~ U(-1/sqrt(in), 1/sqrt(in)) mimic PyTorch's default init.
    static_adj = jnp.ones((N, N), dtype=jnp.float32) * 0.1
    bound = float(C) ** -0.5
    w_static = jax.random.uniform(kws, (C, C), jnp.float32, -bound, bound)
    w_dynamic = jax.random.uniform(kwd, (C, C), jnp.float32, -bound, bound)

    ref = graph_conv_reference(x, features, static_adj, w_static, w_dynamic)

    # Full-precision MXU path: tight check (only the EUP approx reciprocal
    # in the softmax normalization differs from the pure-f32 reference).
    out_f32 = jax.block_until_ready(
        graph_conv(x, features, static_adj, w_static, w_dynamic,
                   mxu_dtype=jnp.float32))
    assert out_f32.shape == (B, N, C)
    assert jnp.allclose(out_f32, ref, atol=2e-3, rtol=2e-3), "f32 path mismatch"

    # Default path: bf16 MXU operands with f32 accumulation (scores/softmax and
    # the epilogue stay f32) -> looser tolerance for bf16 operand rounding.
    out = jax.block_until_ready(
        graph_conv(x, features, static_adj, w_static, w_dynamic))
    assert out.shape == (B, N, C)
    assert jnp.allclose(out, ref, atol=5e-2, rtol=5e-2), "bf16 path mismatch"

    print("KERNEL_OK")
</pallas_src>

<mosaic_0001>
module attributes {stable_mosaic.version = 11 : i64} {
  func.func @graphconv_kernel(%arg0: i32, %arg1: memref<16x16xf32, #tpu.memory_space<vmem>>, %arg2: memref<32x32xf32, #tpu.memory_space<vmem>>, %arg3: memref<32x32xf32, #tpu.memory_space<vmem>>, %arg4: memref<16x64xf32, #tpu.memory_space<vmem>>, %arg5: memref<16x64xf32, #tpu.memory_space<vmem>>, %arg6: memref<16x64xf32, #tpu.memory_space<vmem>>) attributes {dimension_semantics = [#tpu.dimension_semantics<parallel>], iteration_bounds = array<i64: 1>, scalar_prefetch = 0 : i64, scratch_operands = 0 : i64, tpu.core_type = #tpu.core_type<tc>, window_params = [{pipeline_mode = #tpu.pipeline_mode<synchronous>, transform_indices = @transform_0, window_bounds = array<i64: 16, 16>}, {pipeline_mode = #tpu.pipeline_mode<synchronous>, transform_indices = @transform_1, window_bounds = array<i64: 32, 32>}, {pipeline_mode = #tpu.pipeline_mode<synchronous>, transform_indices = @transform_2, window_bounds = array<i64: 32, 32>}, {transform_indices = @transform_3, window_bounds = array<i64: 16, 64>}, {transform_indices = @transform_4, window_bounds = array<i64: 16, 64>}, {transform_indices = @transform_5, window_bounds = array<i64: 16, 64>}]} {
    %c0 = arith.constant 0 : index
    %c0_0 = arith.constant 0 : index
    %0 = vector.load %arg1[%c0, %c0_0] : memref<16x16xf32, #tpu.memory_space<vmem>>, vector<16x16xf32>
    %c0_1 = arith.constant 0 : index
    %c0_2 = arith.constant 0 : index
    %1 = vector.load %arg2[%c0_1, %c0_2] : memref<32x32xf32, #tpu.memory_space<vmem>>, vector<32x32xf32>
    %c0_3 = arith.constant 0 : index
    %c0_4 = arith.constant 0 : index
    %2 = vector.load %arg3[%c0_3, %c0_4] : memref<32x32xf32, #tpu.memory_space<vmem>>, vector<32x32xf32>
    %c0_5 = arith.constant 0 : index
    %c0_6 = arith.constant 0 : index
    %3 = vector.load %arg4[%c0_5, %c0_6] : memref<16x64xf32, #tpu.memory_space<vmem>>, vector<16x64xf32>
    %cst = arith.constant dense<0.000000e+00> : vector<16x64xf32>
    %4 = tpu.matmul %0, %3, %cst {dimension_numbers = #tpu.dot_dimension_numbers<[1], [0], [0], [1], [0, 0, 1, 1], [], []>} : vector<16x16xf32>, vector<16x64xf32>, vector<16x64xf32> -> vector<16x64xf32>
    %5 = vector.extract_strided_slice %3 {offsets = [0, 0], sizes = [16, 32], strides = [1, 1]} : vector<16x64xf32> to vector<16x32xf32>
    %6 = vector.extract_strided_slice %4 {offsets = [0, 0], sizes = [16, 32], strides = [1, 1]} : vector<16x64xf32> to vector<16x32xf32>
    %cst_7 = arith.constant dense<0.000000e+00> : vector<16x32xf32>
    %7 = tpu.matmul %6, %1, %cst_7 {dimension_numbers = #tpu.dot_dimension_numbers<[1], [0], [0], [1], [0, 0, 1, 1], [], []>} : vector<16x32xf32>, vector<32x32xf32>, vector<16x32xf32> -> vector<16x32xf32>
    %c0_8 = arith.constant 0 : index
    %c0_9 = arith.constant 0 : index
    %8 = vector.load %arg5[%c0_8, %c0_9] : memref<16x64xf32, #tpu.memory_space<vmem>>, vector<16x32xf32>
    %cst_10 = arith.constant dense<0.000000e+00> : vector<16x16xf32>
    %9 = tpu.matmul %8, %8, %cst_10 {dimension_numbers = #tpu.dot_dimension_numbers<[1], [1], [0], [0], [0, 0, 1, 0], [], []>} : vector<16x32xf32>, vector<16x32xf32>, vector<16x16xf32> -> vector<16x16xf32>
    %cst_11 = arith.constant dense<0xFF800000> : vector<16xf32>
    %10 = vector.multi_reduction <maximumf>, %9, %cst_11 [1] : vector<16x16xf32> to vector<16xf32>
    %11 = vector.shape_cast %10 : vector<16xf32> to vector<16x1xf32>
    %12 = vector.broadcast %11 : vector<16x1xf32> to vector<16x16xf32>
    %13 = arith.subf %9, %12 : vector<16x16xf32>
    %14 = math.exp %13 : vector<16x16xf32>
    %cst_12 = arith.constant dense<0.000000e+00> : vector<16xf32>
    %15 = vector.multi_reduction <add>, %14, %cst_12 [1] : vector<16x16xf32> to vector<16xf32>
    %16 = vector.shape_cast %15 : vector<16xf32> to vector<16x1xf32>
    %cst_13 = arith.constant dense<0.000000e+00> : vector<16x32xf32>
    %17 = tpu.matmul %14, %5, %cst_13 {dimension_numbers = #tpu.dot_dimension_numbers<[1], [0], [0], [1], [0, 0, 1, 1], [], []>} : vector<16x16xf32>, vector<16x32xf32>, vector<16x32xf32> -> vector<16x32xf32>
    %18 = tpu.reciprocal %16 {approx = true} : vector<16x1xf32> -> vector<16x1xf32>
    %19 = vector.broadcast %18 : vector<16x1xf32> to vector<16x32xf32>
    %20 = arith.mulf %17, %19 : vector<16x32xf32>
    %cst_14 = arith.constant dense<0.000000e+00> : vector<16x32xf32>
    %21 = tpu.matmul %20, %2, %cst_14 {dimension_numbers = #tpu.dot_dimension_numbers<[1], [0], [0], [1], [0, 0, 1, 1], [], []>} : vector<16x32xf32>, vector<32x32xf32>, vector<16x32xf32> -> vector<16x32xf32>
    %cst_15 = arith.constant 0.000000e+00 : f32
    %22 = vector.broadcast %cst_15 : f32 to vector<16x32xf32>
    %23 = arith.cmpf ogt, %7, %22 : vector<16x32xf32>
    %cst_16 = arith.constant 0.00999999977 : f32
    %24 = vector.broadcast %cst_16 : f32 to vector<16x32xf32>
    %25 = arith.mulf %24, %7 : vector<16x32xf32>
    %26 = arith.select %23, %7, %25 : vector<16x32xi1>, vector<16x32xf32>
    %cst_17 = arith.constant 0.000000e+00 : f32
    %27 = vector.broadcast %cst_17 : f32 to vector<16x32xf32>
    %28 = arith.cmpf ogt, %21, %27 : vector<16x32xf32>
    %cst_18 = arith.constant 0.00999999977 : f32
    %29 = vector.broadcast %cst_18 : f32 to vector<16x32xf32>
    %30 = arith.mulf %29, %21 : vector<16x32xf32>
    %31 = arith.select %28, %21, %30 : vector<16x32xi1>, vector<16x32xf32>
    %32 = arith.addf %26, %31 : vector<16x32xf32>
    %c0_19 = arith.constant 0 : index
    %c0_20 = arith.constant 0 : index
    %33 = vector.load %arg6[%c0_19, %c0_20] : memref<16x64xf32, #tpu.memory_space<vmem>>, vector<16x32xf32>
    tpu.vector_store %arg6[%c0_19, %c0_20], %32 {strides = array<i32>} : memref<16x64xf32, #tpu.memory_space<vmem>>, vector<16x32xf32>,
    %34 = vector.extract_strided_slice %3 {offsets = [0, 32], sizes = [16, 32], strides = [1, 1]} : vector<16x64xf32> to vector<16x32xf32>
    %35 = vector.extract_strided_slice %4 {offsets = [0, 32], sizes = [16, 32], strides = [1, 1]} : vector<16x64xf32> to vector<16x32xf32>
    %cst_21 = arith.constant dense<0.000000e+00> : vector<16x32xf32>
    %36 = tpu.matmul %35, %1, %cst_21 {dimension_numbers = #tpu.dot_dimension_numbers<[1], [0], [0], [1], [0, 0, 1, 1], [], []>} : vector<16x32xf32>, vector<32x32xf32>, vector<16x32xf32> -> vector<16x32xf32>
    %c0_22 = arith.constant 0 : index
    %c32 = arith.constant 32 : index
    %37 = vector.load %arg5[%c0_22, %c32] : memref<16x64xf32, #tpu.memory_space<vmem>>, vector<16x32xf32>
    %cst_23 = arith.constant dense<0.000000e+00> : vector<16x16xf32>
    %38 = tpu.matmul %37, %37, %cst_23 {dimension_numbers = #tpu.dot_dimension_numbers<[1], [1], [0], [0], [0, 0, 1, 0], [], []>} : vector<16x32xf32>, vector<16x32xf32>, vector<16x16xf32> -> vector<16x16xf32>
    %cst_24 = arith.constant dense<0xFF800000> : vector<16xf32>
    %39 = vector.multi_reduction <maximumf>, %38, %cst_24 [1] : vector<16x16xf32> to vector<16xf32>
    %40 = vector.shape_cast %39 : vector<16xf32> to vector<16x1xf32>
    %41 = vector.broadcast %40 : vector<16x1xf32> to vector<16x16xf32>
    %42 = arith.subf %38, %41 : vector<16x16xf32>
    %43 = math.exp %42 : vector<16x16xf32>
    %cst_25 = arith.constant dense<0.000000e+00> : vector<16xf32>
    %44 = vector.multi_reduction <add>, %43, %cst_25 [1] : vector<16x16xf32> to vector<16xf32>
    %45 = vector.shape_cast %44 : vector<16xf32> to vector<16x1xf32>
    %cst_26 = arith.constant dense<0.000000e+00> : vector<16x32xf32>
    %46 = tpu.matmul %43, %34, %cst_26 {dimension_numbers = #tpu.dot_dimension_numbers<[1], [0], [0], [1], [0, 0, 1, 1], [], []>} : vector<16x16xf32>, vector<16x32xf32>, vector<16x32xf32> -> vector<16x32xf32>
    %47 = tpu.reciprocal %45 {approx = true} : vector<16x1xf32> -> vector<16x1xf32>
    %48 = vector.broadcast %47 : vector<16x1xf32> to vector<16x32xf32>
    %49 = arith.mulf %46, %48 : vector<16x32xf32>
    %cst_27 = arith.constant dense<0.000000e+00> : vector<16x32xf32>
    %50 = tpu.matmul %49, %2, %cst_27 {dimension_numbers = #tpu.dot_dimension_numbers<[1], [0], [0], [1], [0, 0, 1, 1], [], []>} : vector<16x32xf32>, vector<32x32xf32>, vector<16x32xf32> -> vector<16x32xf32>
    %cst_28 = arith.constant 0.000000e+00 : f32
    %51 = vector.broadcast %cst_28 : f32 to vector<16x32xf32>
    %52 = arith.cmpf ogt, %36, %51 : vector<16x32xf32>
    %cst_29 = arith.constant 0.00999999977 : f32
    %53 = vector.broadcast %cst_29 : f32 to vector<16x32xf32>
    %54 = arith.mulf %53, %36 : vector<16x32xf32>
    %55 = arith.select %52, %36, %54 : vector<16x32xi1>, vector<16x32xf32>
    %cst_30 = arith.constant 0.000000e+00 : f32
    %56 = vector.broadcast %cst_30 : f32 to vector<16x32xf32>
    %57 = arith.cmpf ogt, %50, %56 : vector<16x32xf32>
    %cst_31 = arith.constant 0.00999999977 : f32
    %58 = vector.broadcast %cst_31 : f32 to vector<16x32xf32>
    %59 = arith.mulf %58, %50 : vector<16x32xf32>
    %60 = arith.select %57, %50, %59 : vector<16x32xi1>, vector<16x32xf32>
    %61 = arith.addf %55, %60 : vector<16x32xf32>
    %c0_32 = arith.constant 0 : index
    %c32_33 = arith.constant 32 : index
    %62 = vector.load %arg6[%c0_32, %c32_33] : memref<16x64xf32, #tpu.memory_space<vmem>>, vector<16x32xf32>
    tpu.vector_store %arg6[%c0_32, %c32_33], %61 {strides = array<i32>} : memref<16x64xf32, #tpu.memory_space<vmem>>, vector<16x32xf32>,
    return
  }
  func.func @transform_0(%arg0: i32) -> (i32, i32) {
    %c0_i32 = arith.constant 0 : i32
    %c0_i32_0 = arith.constant 0 : i32
    %c0_i32_1 = arith.constant 0 : i32
    return %c0_i32, %c0_i32_0 : i32, i32
  }
  func.func @transform_1(%arg0: i32) -> (i32, i32) {
    %c0_i32 = arith.constant 0 : i32
    %c0_i32_0 = arith.constant 0 : i32
    %c0_i32_1 = arith.constant 0 : i32
    return %c0_i32, %c0_i32_0 : i32, i32
  }
  func.func @transform_2(%arg0: i32) -> (i32, i32) {
    %c0_i32 = arith.constant 0 : i32
    %c0_i32_0 = arith.constant 0 : i32
    %c0_i32_1 = arith.constant 0 : i32
    return %c0_i32, %c0_i32_0 : i32, i32
  }
  func.func @transform_3(%arg0: i32) -> (i32, i32) {
    %c0_i32 = arith.constant 0 : i32
    %c0_i32_0 = arith.constant 0 : i32
    return %c0_i32, %arg0 : i32, i32
  }
  func.func @transform_4(%arg0: i32) -> (i32, i32) {
    %c0_i32 = arith.constant 0 : i32
    %c0_i32_0 = arith.constant 0 : i32
    return %c0_i32, %arg0 : i32, i32
  }
  func.func @transform_5(%arg0: i32) -> (i32, i32) {
    %c0_i32 = arith.constant 0 : i32
    %c0_i32_0 = arith.constant 0 : i32
    return %c0_i32, %arg0 : i32, i32
  }
}

module attributes {stable_mosaic.version = 11 : i64} {
  func.func @graphconv_kernel(%arg0: i32, %arg1: memref<16x16xf32, #tpu.memory_space<vmem>>, %arg2: memref<32x32xf32, #tpu.memory_space<vmem>>, %arg3: memref<32x32xf32, #tpu.memory_space<vmem>>, %arg4: memref<16x64xf32, #tpu.memory_space<vmem>>, %arg5: memref<16x64xf32, #tpu.memory_space<vmem>>, %arg6: memref<16x64xf32, #tpu.memory_space<vmem>>) attributes {dimension_semantics = [#tpu.dimension_semantics<parallel>], iteration_bounds = array<i64: 1>, scalar_prefetch = 0 : i64, scratch_operands = 0 : i64, tpu.core_type = #tpu.core_type<tc>, window_params = [{pipeline_mode = #tpu.pipeline_mode<synchronous>, transform_indices = @transform_0, window_bounds = array<i64: 16, 16>}, {pipeline_mode = #tpu.pipeline_mode<synchronous>, transform_indices = @transform_1, window_bounds = array<i64: 32, 32>}, {pipeline_mode = #tpu.pipeline_mode<synchronous>, transform_indices = @transform_2, window_bounds = array<i64: 32, 32>}, {transform_indices = @transform_3, window_bounds = array<i64: 16, 64>}, {transform_indices = @transform_4, window_bounds = array<i64: 16, 64>}, {transform_indices = @transform_5, window_bounds = array<i64: 16, 64>}]} {
    %c0 = arith.constant 0 : index
    %c0_0 = arith.constant 0 : index
    %0 = vector.load %arg1[%c0, %c0_0] : memref<16x16xf32, #tpu.memory_space<vmem>>, vector<16x16xf32>
    %c0_1 = arith.constant 0 : index
    %c0_2 = arith.constant 0 : index
    %1 = vector.load %arg2[%c0_1, %c0_2] : memref<32x32xf32, #tpu.memory_space<vmem>>, vector<32x32xf32>
    %c0_3 = arith.constant 0 : index
    %c0_4 = arith.constant 0 : index
    %2 = vector.load %arg3[%c0_3, %c0_4] : memref<32x32xf32, #tpu.memory_space<vmem>>, vector<32x32xf32>
    %c0_5 = arith.constant 0 : index
    %c0_6 = arith.constant 0 : index
    %3 = vector.load %arg4[%c0_5, %c0_6] : memref<16x64xf32, #tpu.memory_space<vmem>>, vector<16x64xf32>
    %cst = arith.constant dense<0.000000e+00> : vector<16x64xf32>
    %4 = tpu.matmul %0, %3, %cst {dimension_numbers = #tpu.dot_dimension_numbers<[1], [0], [0], [1], [0, 0, 1, 1], [], []>} : vector<16x16xf32>, vector<16x64xf32>, vector<16x64xf32> -> vector<16x64xf32>
    %5 = vector.extract_strided_slice %3 {offsets = [0, 0], sizes = [16, 32], strides = [1, 1]} : vector<16x64xf32> to vector<16x32xf32>
    %6 = vector.extract_strided_slice %4 {offsets = [0, 0], sizes = [16, 32], strides = [1, 1]} : vector<16x64xf32> to vector<16x32xf32>
    %cst_7 = arith.constant dense<0.000000e+00> : vector<16x32xf32>
    %7 = tpu.matmul %6, %1, %cst_7 {dimension_numbers = #tpu.dot_dimension_numbers<[1], [0], [0], [1], [0, 0, 1, 1], [], []>} : vector<16x32xf32>, vector<32x32xf32>, vector<16x32xf32> -> vector<16x32xf32>
    %c0_8 = arith.constant 0 : index
    %c0_9 = arith.constant 0 : index
    %8 = vector.load %arg5[%c0_8, %c0_9] : memref<16x64xf32, #tpu.memory_space<vmem>>, vector<16x32xf32>
    %cst_10 = arith.constant dense<0.000000e+00> : vector<16x16xf32>
    %9 = tpu.matmul %8, %8, %cst_10 {dimension_numbers = #tpu.dot_dimension_numbers<[1], [1], [0], [0], [0, 0, 1, 0], [], []>} : vector<16x32xf32>, vector<16x32xf32>, vector<16x16xf32> -> vector<16x16xf32>
    %cst_11 = arith.constant dense<0xFF800000> : vector<16xf32>
    %10 = vector.multi_reduction <maximumf>, %9, %cst_11 [1] : vector<16x16xf32> to vector<16xf32>
    %11 = vector.shape_cast %10 : vector<16xf32> to vector<16x1xf32>
    %12 = vector.broadcast %11 : vector<16x1xf32> to vector<16x16xf32>
    %13 = arith.subf %9, %12 : vector<16x16xf32>
    %14 = math.exp %13 : vector<16x16xf32>
    %cst_12 = arith.constant dense<0.000000e+00> : vector<16xf32>
    %15 = vector.multi_reduction <add>, %14, %cst_12 [1] : vector<16x16xf32> to vector<16xf32>
    %16 = vector.shape_cast %15 : vector<16xf32> to vector<16x1xf32>
    %cst_13 = arith.constant dense<0.000000e+00> : vector<16x32xf32>
    %17 = tpu.matmul %14, %5, %cst_13 {dimension_numbers = #tpu.dot_dimension_numbers<[1], [0], [0], [1], [0, 0, 1, 1], [], []>} : vector<16x16xf32>, vector<16x32xf32>, vector<16x32xf32> -> vector<16x32xf32>
    %18 = tpu.reciprocal %16 {approx = true} : vector<16x1xf32> -> vector<16x1xf32>
    %19 = vector.broadcast %18 : vector<16x1xf32> to vector<16x32xf32>
    %20 = arith.mulf %17, %19 : vector<16x32xf32>
    %cst_14 = arith.constant dense<0.000000e+00> : vector<16x32xf32>
    %21 = tpu.matmul %20, %2, %cst_14 {dimension_numbers = #tpu.dot_dimension_numbers<[1], [0], [0], [1], [0, 0, 1, 1], [], []>} : vector<16x32xf32>, vector<32x32xf32>, vector<16x32xf32> -> vector<16x32xf32>
    %cst_15 = arith.constant 0.000000e+00 : f32
    %22 = vector.broadcast %cst_15 : f32 to vector<16x32xf32>
    %23 = arith.cmpf ogt, %7, %22 : vector<16x32xf32>
    %cst_16 = arith.constant 0.00999999977 : f32
    %24 = vector.broadcast %cst_16 : f32 to vector<16x32xf32>
    %25 = arith.mulf %24, %7 : vector<16x32xf32>
    %26 = arith.select %23, %7, %25 : vector<16x32xi1>, vector<16x32xf32>
    %cst_17 = arith.constant 0.000000e+00 : f32
    %27 = vector.broadcast %cst_17 : f32 to vector<16x32xf32>
    %28 = arith.cmpf ogt, %21, %27 : vector<16x32xf32>
    %cst_18 = arith.constant 0.00999999977 : f32
    %29 = vector.broadcast %cst_18 : f32 to vector<16x32xf32>
    %30 = arith.mulf %29, %21 : vector<16x32xf32>
    %31 = arith.select %28, %21, %30 : vector<16x32xi1>, vector<16x32xf32>
    %32 = arith.addf %26, %31 : vector<16x32xf32>
    %c0_19 = arith.constant 0 : index
    %c0_20 = arith.constant 0 : index
    %33 = vector.load %arg6[%c0_19, %c0_20] : memref<16x64xf32, #tpu.memory_space<vmem>>, vector<16x32xf32>
    tpu.vector_store %arg6[%c0_19, %c0_20], %32 {strides = array<i32>} : memref<16x64xf32, #tpu.memory_space<vmem>>, vector<16x32xf32>,
    %34 = vector.extract_strided_slice %3 {offsets = [0, 32], sizes = [16, 32], strides = [1, 1]} : vector<16x64xf32> to vector<16x32xf32>
    %35 = vector.extract_strided_slice %4 {offsets = [0, 32], sizes = [16, 32], strides = [1, 1]} : vector<16x64xf32> to vector<16x32xf32>
    %cst_21 = arith.constant dense<0.000000e+00> : vector<16x32xf32>
    %36 = tpu.matmul %35, %1, %cst_21 {dimension_numbers = #tpu.dot_dimension_numbers<[1], [0], [0], [1], [0, 0, 1, 1], [], []>} : vector<16x32xf32>, vector<32x32xf32>, vector<16x32xf32> -> vector<16x32xf32>
    %c0_22 = arith.constant 0 : index
    %c32 = arith.constant 32 : index
    %37 = vector.load %arg5[%c0_22, %c32] : memref<16x64xf32, #tpu.memory_space<vmem>>, vector<16x32xf32>
    %cst_23 = arith.constant dense<0.000000e+00> : vector<16x16xf32>
    %38 = tpu.matmul %37, %37, %cst_23 {dimension_numbers = #tpu.dot_dimension_numbers<[1], [1], [0], [0], [0, 0, 1, 0], [], []>} : vector<16x32xf32>, vector<16x32xf32>, vector<16x16xf32> -> vector<16x16xf32>
    %cst_24 = arith.constant dense<0xFF800000> : vector<16xf32>
    %39 = vector.multi_reduction <maximumf>, %38, %cst_24 [1] : vector<16x16xf32> to vector<16xf32>
    %40 = vector.shape_cast %39 : vector<16xf32> to vector<16x1xf32>
    %41 = vector.broadcast %40 : vector<16x1xf32> to vector<16x16xf32>
    %42 = arith.subf %38, %41 : vector<16x16xf32>
    %43 = math.exp %42 : vector<16x16xf32>
    %cst_25 = arith.constant dense<0.000000e+00> : vector<16xf32>
    %44 = vector.multi_reduction <add>, %43, %cst_25 [1] : vector<16x16xf32> to vector<16xf32>
    %45 = vector.shape_cast %44 : vector<16xf32> to vector<16x1xf32>
    %cst_26 = arith.constant dense<0.000000e+00> : vector<16x32xf32>
    %46 = tpu.matmul %43, %34, %cst_26 {dimension_numbers = #tpu.dot_dimension_numbers<[1], [0], [0], [1], [0, 0, 1, 1], [], []>} : vector<16x16xf32>, vector<16x32xf32>, vector<16x32xf32> -> vector<16x32xf32>
    %47 = tpu.reciprocal %45 {approx = true} : vector<16x1xf32> -> vector<16x1xf32>
    %48 = vector.broadcast %47 : vector<16x1xf32> to vector<16x32xf32>
    %49 = arith.mulf %46, %48 : vector<16x32xf32>
    %cst_27 = arith.constant dense<0.000000e+00> : vector<16x32xf32>
    %50 = tpu.matmul %49, %2, %cst_27 {dimension_numbers = #tpu.dot_dimension_numbers<[1], [0], [0], [1], [0, 0, 1, 1], [], []>} : vector<16x32xf32>, vector<32x32xf32>, vector<16x32xf32> -> vector<16x32xf32>
    %cst_28 = arith.constant 0.000000e+00 : f32
    %51 = vector.broadcast %cst_28 : f32 to vector<16x32xf32>
    %52 = arith.cmpf ogt, %36, %51 : vector<16x32xf32>
    %cst_29 = arith.constant 0.00999999977 : f32
    %53 = vector.broadcast %cst_29 : f32 to vector<16x32xf32>
    %54 = arith.mulf %53, %36 : vector<16x32xf32>
    %55 = arith.select %52, %36, %54 : vector<16x32xi1>, vector<16x32xf32>
    %cst_30 = arith.constant 0.000000e+00 : f32
    %56 = vector.broadcast %cst_30 : f32 to vector<16x32xf32>
    %57 = arith.cmpf ogt, %50, %56 : vector<16x32xf32>
    %cst_31 = arith.constant 0.00999999977 : f32
    %58 = vector.broadcast %cst_31 : f32 to vector<16x32xf32>
    %59 = arith.mulf %58, %50 : vector<16x32xf32>
    %60 = arith.select %57, %50, %59 : vector<16x32xi1>, vector<16x32xf32>
    %61 = arith.addf %55, %60 : vector<16x32xf32>
    %c0_32 = arith.constant 0 : index
    %c32_33 = arith.constant 32 : index
    %62 = vector.load %arg6[%c0_32, %c32_33] : memref<16x64xf32, #tpu.memory_space<vmem>>, vector<16x32xf32>
    tpu.vector_store %arg6[%c0_32, %c32_33], %61 {strides = array<i32>} : memref<16x64xf32, #tpu.memory_space<vmem>>, vector<16x32xf32>,
    return
  }
  func.func @transform_0(%arg0: i32) -> (i32, i32) {
    %c0_i32 = arith.constant 0 : i32
    %c0_i32_0 = arith.constant 0 : i32
    %c0_i32_1 = arith.constant 0 : i32
    return %c0_i32, %c0_i32_0 : i32, i32
  }
  func.func @transform_1(%arg0: i32) -> (i32, i32) {
    %c0_i32 = arith.constant 0 : i32
    %c0_i32_0 = arith.constant 0 : i32
    %c0_i32_1 = arith.constant 0 : i32
    return %c0_i32, %c0_i32_0 : i32, i32
  }
  func.func @transform_2(%arg0: i32) -> (i32, i32) {
    %c0_i32 = arith.constant 0 : i32
    %c0_i32_0 = arith.constant 0 : i32
    %c0_i32_1 = arith.constant 0 : i32
    return %c0_i32, %c0_i32_0 : i32, i32
  }
  func.func @transform_3(%arg0: i32) -> (i32, i32) {
    %c0_i32 = arith.constant 0 : i32
    %c0_i32_0 = arith.constant 0 : i32
    return %c0_i32, %arg0 : i32, i32
  }
  func.func @transform_4(%arg0: i32) -> (i32, i32) {
    %c0_i32 = arith.constant 0 : i32
    %c0_i32_0 = arith.constant 0 : i32
    return %c0_i32, %arg0 : i32, i32
  }
  func.func @transform_5(%arg0: i32) -> (i32, i32) {
    %c0_i32 = arith.constant 0 : i32
    %c0_i32_0 = arith.constant 0 : i32
    return %c0_i32, %arg0 : i32, i32
  }
}

</mosaic_0001>

<bundles_post_ra>
// kernel: tpu_custom_call.1
= control target key start
LH: loop header
LB: loop body
LE: loop exit
PB: predicated region body
PF: predicated region fallthrough
CT: control target
= control target key end

     0   :  { %10 = vsyncpa [#allocation3], 0  ;;  %s1413_s0 = inlined_call_operand.hbm [shape: f32[16,16], index: 0, kind: input, shape index: {}]   ;;  %s1414_s1 = inlined_call_operand.hbm [shape: f32[32,32], index: 1, kind: input, shape index: {}]   ;;  %s1415_s2 = inlined_call_operand.hbm [shape: f32[32,32], index: 2, kind: input, shape index: {}]   ;;  %s1416_s3 = inlined_call_operand.hbm [shape: f32[16,64], index: 3, kind: input, shape index: {}]   ;;  %s1417_s4 = inlined_call_operand.hbm [shape: f32[16,64], index: 4, kind: input, shape index: {}]   ;;  %s1418_s5 = inlined_call_operand.hbm [shape: f32[16,64], index: 5, kind: output, shape index: {}]  }
   0x1   :  { %11 = vsyncpa [#allocation6], 0 }
   0x2   :  { %12 = vsyncpa [#allocation9], 0 }
   0x3   :  { %13 = vsyncpa [#allocation4], 0  ;;  %s1253_s18 = smov [#allocation5]   ;;  %s1254_s20 = smov [#allocation8]  }
   0x4   :  { %s31_s19 = sshll.u32 %s1253_s18, 4  ;;  %s55_s21 = sshll.u32 %s1254_s20, 4  ;;  %s32_s19 = int_to_ptr.vmem [resolvable:$true] %s31_s19  ;;  %s56_s21 = int_to_ptr.vmem [resolvable:$true] %s55_s21 }
   0x5   :  { %s1133_s22 = scalar_lea.vmem %s32_s19, 512  ;;  %p1138_p1 = scmp.lt.s32.totalorder %s32_s19, %s32_s19 }
   0x6   :  { %p1134_p0 = scmp.ne.s32.totalorder %s32_s19, %s1133_s22  ;;  %p1139_p2 = scmp.lt.s32.totalorder %s1133_s22, %s1133_s22 }
   0x8   :  { %p1140_p3 = por %p1139_p2, %p1138_p1 }
   0xa   :  { %p1141_p4 = pnand %p1140_p3, %p1134_p0 }
   0xc   :  { %1144 = shalt.err (!%p1141_p4)
}
   0xd   :  { %s1255_s23 = smov 128   ;;  %s1256_s24 = smov 8  }
   0xe   :  { %37 = dma.hbm_to_vmem [thread:$0]  %s1414_s1, 512, %s32_s19, [#allocation6], %s1255_s23, %s1255_s23, %s1256_s24  }
   0xf   :  { %s1153_s27 = scalar_lea.vmem %s56_s21, 256  ;;  %p1158_p6 = scmp.lt.s32.totalorder %s56_s21, %s56_s21 }
  0x10   :  { %p1154_p5 = scmp.ne.s32.totalorder %s56_s21, %s1153_s27  ;;  %p1159_p7 = scmp.lt.s32.totalorder %s1153_s27, %s1153_s27 }
  0x12   :  { %p1160_p8 = por %p1159_p7, %p1158_p6 }
  0x14   :  { %p1161_p9 = pnand %p1160_p8, %p1154_p5 }
  0x16   :  { %1164 = shalt.err (!%p1161_p9)
}
  0x17   :  { %61 = dma.hbm_to_vmem [thread:$0]  %s1416_s3, 256, %s56_s21, [#allocation9], %s1255_s23, %s1255_s23, %s1256_s24  }
  0x18   :  { %s1257_s30 = smov [#allocation2]   ;;  %s1258_s7 = smov [#allocation7]  }
  0x19   :  { %s19_s6 = sshll.u32 %s1257_s30, 4  ;;  %s43_s8 = sshll.u32 %s1258_s7, 4  ;;  %s20_s6 = int_to_ptr.vmem [resolvable:$true] %s19_s6  ;;  %s44_s8 = int_to_ptr.vmem [resolvable:$true] %s43_s8 }
  0x1a   :  { %s1173_s1 = scalar_lea.vmem %s20_s6, 256  ;;  %p1178_p11 = scmp.lt.s32.totalorder %s20_s6, %s20_s6 }
  0x1b   :  { %p1174_p10 = scmp.ne.s32.totalorder %s20_s6, %s1173_s1  ;;  %p1179_p12 = scmp.lt.s32.totalorder %s1173_s1, %s1173_s1 }
  0x1d   :  { %p1180_p13 = por %p1179_p12, %p1178_p11 }
  0x1f   :  { %p1181_p0 = pnand %p1180_p13, %p1174_p10 }
  0x21   :  { %1184 = shalt.err (!%p1181_p0)
}
  0x22   :  { %25 = dma.hbm_to_vmem [thread:$0]  %s1413_s0, 256, %s20_s6, [#allocation3], %s1255_s23, %s1255_s23, %s1256_s24  }
  0x23   :  { %s1193_s3 = scalar_lea.vmem %s44_s8, 512  ;;  %p1198_p2 = scmp.lt.s32.totalorder %s44_s8, %s44_s8 }
  0x24   :  { %p1194_p1 = scmp.ne.s32.totalorder %s44_s8, %s1193_s3  ;;  %p1199_p3 = scmp.lt.s32.totalorder %s1193_s3, %s1193_s3 }
  0x26   :  { %p1200_p4 = por %p1199_p3, %p1198_p2 }
  0x28   :  { %p1201_p5 = pnand %p1200_p4, %p1194_p1 }
  0x2a   :  { %1204 = shalt.err (!%p1201_p5)
}
  0x2b   :  { %49 = dma.hbm_to_vmem [thread:$0]  %s1415_s2, 512, %s44_s8, [#allocation6], %s1255_s23, %s1255_s23, %s1256_s24  }
  0x2c   :  { %s1259_s13 = smov [#allocation10]  }
  0x2d   :  { %s67_s14 = sshll.u32 %s1259_s13, 4  ;;  %s68_s14 = int_to_ptr.vmem [resolvable:$true] %s67_s14 }
  0x2e   :  { %s1213_s15 = scalar_lea.vmem %s68_s14, 256  ;;  %p1218_p7 = scmp.lt.s32.totalorder %s68_s14, %s68_s14 }
  0x2f   :  { %p1214_p6 = scmp.ne.s32.totalorder %s68_s14, %s1213_s15  ;;  %p1219_p8 = scmp.lt.s32.totalorder %s1213_s15, %s1213_s15 }
  0x31   :  { %p1220_p9 = por %p1219_p8, %p1218_p7 }
  0x33   :  { %p1221_p10 = pnand %p1220_p9, %p1214_p6 }
  0x35   :  { %1224 = shalt.err (!%p1221_p10)
}
  0x36   :  { %73 = dma.hbm_to_vmem [thread:$0]  %s1417_s4, 256, %s68_s14, [#allocation9], %s1255_s23, %s1255_s23, %s1256_s24  }
  0x37   :  { %1245 = dma.done.wait [#allocation3], 256  }
  0x38   :  { %1246 = vsyncadd [#allocation3], 4294967040 }
  0x39   :  { %1247 = dma.done.wait [#allocation6], 1024  }
  0x3a   :  { %1248 = vsyncadd [#allocation6], 4294966272 }
  0x3b   :  { %1249 = dma.done.wait [#allocation9], 512  }
  0x3c   :  { %1250 = vsyncadd [#allocation9], 4294966784  ;;  %vm101_vm0 = vcmask 130048   ;;  %v1323_v0 = vld [vmem:[#allocation8 + $0x8] sm:$0xff]  ;;  %v1325_v1 = vld [vmem:[#allocation8] sm:$0xff]  ;;  %vm183_vm1 = vcmask 261120  }
  0x3d   :  { %v89_v2 = vld [vmem:[#allocation2] sm:$0xff]  ;;  %1020 = vmatprep.subr.mxu0 %v1323_v0  ;;  %v90_v3 = vld [vmem:[#allocation2 + $0x8] sm:$0xff]  ;;  %v92_v8 = vld [vmem:[#allocation5 + $0x8] sm:$0xff]  ;;  %s1260_s2 = smov 96   ;;  %s1261_s4 = smov 32   ;;  %vm932_vm10 = vcmask 523520  }
  0x3e   :  { %1024 = vmatprep.mubr.msk.f32.mxu0 %vm101_vm0, %v89_v2  ;;  %1021 = vmatpush3.msra.mxu0 %v1323_v0  ;;  %v266_v4 = vld [vmem:[#allocation10 + $0x8] sm:$0xff]  ;;  %v265_v6 = vld [vmem:[#allocation10] sm:$0xff]  ;;  %v91_v9 = vld [vmem:[#allocation5] sm:$0xff]  ;;  %s1262_s17 = smov [#allocation11]  }
  0x3f   :  { %v94_v5 = vld [vmem:[#allocation5 + $0x18] sm:$0xff]  ;;  %1022 = vmatprep.subr.mxu0 %v1325_v1  ;;  %v93_v7 = vld [vmem:[#allocation5 + $0x10] sm:$0xff]  ;;  %v1367_v28 = vld [vmem:[#allocation7 + $0x8] sm:$0xff]  ;;  %s940_s18 = sshll.u32 %s1262_s17, 4  ;;  %s941_s18 = int_to_ptr.vmem [resolvable:$true] %s940_s18 }
  0x40   :  { %1027 = vmatprep.subr.mxu1 %v94_v5  ;;  %1023 = vmatpush3.msra.mxu0 %v1325_v1  ;;  %v1356_v26 = vld [vmem:[#allocation7 + $0x18] sm:$0xff]  ;;  %v1358_v27 = vld [vmem:[#allocation7 + $0x10] sm:$0xff]  ;;  %v1371_v29 = vld [vmem:[#allocation7] sm:$0xff]  ;;  %s1225_s19 = scalar_lea.vmem %s941_s18, 256  ;;  %p1230_p12 = scmp.lt.s32.totalorder %s941_s18, %s941_s18 }
  0x41   :  { %1028 = vmatpush3.msra.mxu1 %v94_v5  ;;  %1025 = vmatmul.mubr.msk.f32.vlgmr.msra.gmra.mxu0 %vm101_vm0, %v90_v3  ;;  %p1226_p11 = scmp.ne.s32.totalorder %s941_s18, %s1225_s19  ;;  %p1231_p13 = scmp.lt.s32.totalorder %s1225_s19, %s1225_s19 }
  0x42   :  { %1038 = vmatprep.subr.msk.mxu0 %vm183_vm1, %v266_v4  ;;  %1042 = vmatprep.mubr.msk.f32.mxu0 %vm183_vm1, %v265_v6 }
  0x43   :  { %1039 = vmatpush3.xpose.msk.msra.mxu0 %vm183_vm1, %v266_v4  ;;  %1029 = vmatprep.subr.mxu1 %v93_v7  ;;  %p1232_p0 = por %p1231_p13, %p1230_p12 }
  0x44   :  { %1040 = vmatprep.subr.msk.mxu0 %vm183_vm1, %v265_v6  ;;  %1030 = vmatpush3.msra.mxu1 %v93_v7 }
  0x45   :  { %1031 = vmatprep.subr.mxu1 %v92_v8  ;;  %p1233_p1 = pnand %p1232_p0, %p1226_p11 }
  0x46   :  { %1032 = vmatpush3.msra.mxu1 %v92_v8 }
  0x47   :  { %1041 = vmatpush3.xpose.msk.msra.mxu0 %vm183_vm1, %v265_v6  ;;  %1033 = vmatprep.subr.mxu1 %v91_v9 }
  0x48   :  { %1034 = vmatpush3.msra.mxu1 %v91_v9  ;;  %1052 = vmatprep.subr.mxu0 %v1356_v26 }
  0x49   :  { %1045 = vmatprep.subr.mxu1 %v1323_v0 }
  0x4a   :  { %1043 = vmatmul.mubr.msk.f32.vlgmr.msra.gmra.mxu0 %vm183_vm1, %v266_v4 }
  0x4b   :  { %1053 = vmatpush3.msra.mxu0 %v1356_v26 }
  0x4c   :  { %1054 = vmatprep.subr.mxu0 %v1358_v27 }
  0x4d   :  { %1055 = vmatpush3.msra.mxu0 %v1358_v27 }
  0x4e   :  { %1056 = vmatprep.subr.mxu0 %v1367_v28 }
  0x4f   :  { %1057 = vmatpush3.msra.mxu0 %v1367_v28 }
  0x50   :  { %1058 = vmatprep.subr.mxu0 %v1371_v29 }
  0x51   :  { %1059 = vmatpush3.msra.mxu0 %v1371_v29 }
 0x101   :  { %v1026_v10 = vpop.f32.mrf.mxu0 }
 0x103   :  { %v1340_v11 = vpop.f32.mrf.mxu0 }
 0x104   :  { %1035 = vmatprep.mubr.msk.f32.mxu1 %vm183_vm1, %v1340_v11 }
 0x105   :  { %1036 = vmatmul.mubr.msk.f32.vlgmr.msra.gmra.mxu1 %vm183_vm1, %v1026_v10 }
 0x106   :  { %1046 = vmatpush3.msra.mxu1 %v1323_v0 }
 0x107   :  { %1047 = vmatprep.subr.mxu1 %v1325_v1 }
 0x108   :  { %1048 = vmatpush3.msra.mxu1 %v1325_v1 }
 0x109   :  { %1063 = vmatprep.subr.mxu1 %v94_v5 }
 0x10a   :  { %v1044_v12 = vpop.f32.mrf.mxu0 }
 0x10b   :  { %v351_v15 = vsel %vm101_vm0, %v1044_v12, -inf }
 0x10c   :  { %v339_v13 = vpop.f32.mrf.mxu0 }
 0x10d   :  { %v348_v14 = vsel %vm101_vm0, %v339_v13, -inf }
 0x10e   :  { %349 = vmax.xlane.f32.xlu0 %v348_v14 }
 0x112   :  { %352 = vmax.xlane.f32.xlu0 %v351_v15 }
 0x128   :  { %637 = vrot.lane.b32.xlu0 %v266_v4, %s1260_s2 }
 0x197   :  { %v350_v16 = vpop.xlane.xlu0 %349 }
 0x198   :  { %v354_v17 = vsub.f32 %v339_v13, %v350_v16 }
 0x19a   :  { %v356_v18 = vmul.f32 1.442695, %v354_v17 }
 0x19b   :  { %v353_v19 = vpop.xlane.xlu0 %352 }
 0x19c   :  { %1109 = vpow2.f32 %v356_v18  ;;  %v355_v20 = vsub.f32 %v1044_v12, %v353_v19 }
 0x19e   :  { %v358_v21 = vmul.f32 1.442695, %v355_v20 }
 0x19f   :  { %v638_v30 = vpop.permute.xlu0 %637 }
 0x1a0   :  { %1111 = vpow2.f32 %v358_v21  ;;  %1074 = vmatprep.subr.msk.mxu0 %vm183_vm1, %v638_v30 }
 0x1a9   :  { %v1110_v22 = vpop.eup %1109 }
 0x1aa   :  { %1049 = vmatprep.mubr.msk.f32.mxu1 %vm101_vm0, %v1110_v22  ;;  %v360_v25 = vsel %vm101_vm0, %v1110_v22, 0.0 }
 0x1ad   :  { %v1112_v23 = vpop.eup %1111 }
 0x1ae   :  { %1050 = vmatmul.mubr.msk.f32.vlgmr.msra.gmra.mxu1 %vm101_vm0, %v1112_v23  ;;  %v363_v24 = vsel %vm101_vm0, %v1112_v23, 0.0 }
 0x1af   :  { %364 = vadd.xlane.f32.xlu1 %v363_v24  ;;  %1064 = vmatpush3.msra.mxu1 %v94_v5 }
 0x1b0   :  { %1065 = vmatprep.subr.mxu1 %v93_v7 }
 0x1b1   :  { %1066 = vmatpush3.msra.mxu1 %v93_v7 }
 0x1b2   :  { %1067 = vmatprep.subr.mxu1 %v92_v8 }
 0x1b3   :  { %361 = vadd.xlane.f32.xlu1 %v360_v25  ;;  %1068 = vmatpush3.msra.mxu1 %v92_v8 }
 0x1b4   :  { %1069 = vmatprep.subr.mxu1 %v91_v9 }
 0x1b5   :  { %1070 = vmatpush3.msra.mxu1 %v91_v9 }
 0x1c4   :  { %635 = vrot.lane.b32.xlu1 %v265_v6, %s1260_s2 }
 0x1c5   :  { %v1037_v33 = vpop.f32.mrf.mxu1 }
 0x1c6   :  { %v535_v44 = vmul.f32 0.01, %v1037_v33  ;;  %vm533_vm2 = vcmp.gt.f32.partialorder %v1037_v33, 0.0 }
 0x1c7   :  { %v256_v34 = vpop.f32.mrf.mxu1 }
 0x1c8   :  { %550 = vrot.lane.b32.xlu1 %v1026_v10, %s1260_s2  ;;  %v534_v46 = vmul.f32 0.01, %v256_v34  ;;  %vm532_vm4 = vcmp.gt.f32.partialorder %v256_v34, 0.0  ;;  %v537_v49 = vsel %vm533_vm2, %v1037_v33, %v535_v44 }
 0x1ca   :  { %v536_v53 = vsel %vm532_vm4, %v256_v34, %v534_v46 }
 0x1cc   :  { %740 = vrot.lane.b32.xlu1 %v1323_v0, %s1260_s2 }
 0x238   :  { %v365_v31 = vpop.xlane.xlu1 %364 }
 0x23c   :  { %v362_v32 = vpop.xlane.xlu1 %361 }
 0x23d   :  { %1113 = vrcp.f32 %v362_v32 }
 0x23e   :  { %1115 = vrcp.f32 %v365_v31 }
 0x240   :  { %v636_v41 = vpop.permute.xlu1 %635 }
 0x244   :  { %v551_v42 = vpop.permute.xlu1 %550 }
 0x248   :  { %v741_v43 = vpop.permute.xlu1 %740 }
 0x249   :  { %1081 = vmatprep.subr.mxu1 %v741_v43 }
 0x24a   :  { %v1114_v36 = vpop.eup %1113 }
 0x24b   :  { %v1116_v38 = vpop.eup %1115 }
 0x26e   :  { %v1051_v35 = vpop.f32.mrf.mxu1 }
 0x26f   :  { %v450_v40 = vmul.f32 %v1116_v38, %v1051_v35 }
 0x270   :  { %v438_v37 = vpop.f32.mrf.mxu1 }
 0x271   :  { %v449_v39 = vmul.f32 %v1114_v36, %v438_v37 }
 0x273   :  { %1060 = vmatprep.mubr.msk.f32.mxu0 %vm183_vm1, %v449_v39 }
 0x274   :  { %1061 = vmatmul.mubr.msk.f32.vlgmr.msra.gmra.mxu0 %vm183_vm1, %v450_v40 }
 0x275   :  { %1075 = vmatpush3.xpose.msk.msra.mxu0 %vm183_vm1, %v638_v30  ;;  %1078 = vmatprep.mubr.msk.f32.mxu0 %vm183_vm1, %v636_v41 }
 0x276   :  { %1076 = vmatprep.subr.msk.mxu0 %vm183_vm1, %v636_v41 }
 0x279   :  { %1077 = vmatpush3.xpose.msk.msra.mxu0 %vm183_vm1, %v636_v41 }
 0x27c   :  { %1079 = vmatmul.mubr.msk.f32.vlgmr.msra.gmra.mxu0 %vm183_vm1, %v638_v30 }
 0x334   :  { %v1062_v45 = vpop.f32.mrf.mxu0 }
 0x335   :  { %vm539_vm3 = vcmp.gt.f32.partialorder %v1062_v45, 0.0  ;;  %v541_v47 = vmul.f32 0.01, %v1062_v45 }
 0x336   :  { %v523_v48 = vpop.f32.mrf.mxu0 }
 0x337   :  { %v543_v50 = vsel %vm539_vm3, %v1062_v45, %v541_v47  ;;  %vm538_vm5 = vcmp.gt.f32.partialorder %v523_v48, 0.0  ;;  %v540_v51 = vmul.f32 0.01, %v523_v48 }
 0x338   :  { %v545_v52 = vadd.f32 %v543_v50, %v537_v49 }
 0x339   :  { %v542_v54 = vsel %vm538_vm5, %v523_v48, %v540_v51 }
 0x33a   :  { %547 = vst.msk [vmem:[#allocation11 + $0x8] sm:$0xff] %vm183_vm1, %v545_v52  ;;  %v544_v55 = vadd.f32 %v542_v54, %v536_v53 }
 0x33c   :  { %546 = vst.msk [vmem:[#allocation11] sm:$0xff] %vm183_vm1, %v544_v55  ;;  %v1080_v56 = vpop.f32.mrf.mxu0 }
 0x33d   :  { %v721_v57 = vsel %vm101_vm0, %v1080_v56, -inf }
 0x33e   :  { %722 = vmax.xlane.f32.xlu0 %v721_v57  ;;  %v709_v58 = vpop.f32.mrf.mxu0 }
 0x33f   :  { %v718_v59 = vsel %vm101_vm0, %v709_v58, -inf }
 0x340   :  { %719 = vmax.xlane.f32.xlu1 %v718_v59 }
 0x351   :  { %738 = vrot.lane.b32.xlu1 %v1325_v1, %s1260_s2 }
 0x354   :  { %548 = vrot.lane.b32.xlu0 %v1340_v11, %s1260_s2 }
 0x3c7   :  { %v723_v60 = vpop.xlane.xlu0 %722 }
 0x3c8   :  { %v725_v61 = vsub.f32 %v1080_v56, %v723_v60 }
 0x3c9   :  { %v720_v62 = vpop.xlane.xlu1 %719 }
 0x3ca   :  { %v728_v63 = vmul.f32 1.442695, %v725_v61  ;;  %v724_v0 = vsub.f32 %v709_v58, %v720_v62 }
 0x3cb   :  { %v549_v2 = vpop.permute.xlu0 %548 }
 0x3cc   :  { %1117 = vpow2.f32 %v728_v63  ;;  %v726_v3 = vmul.f32 1.442695, %v724_v0  ;;  %1071 = vmatprep.mubr.msk.f32.mxu1 %vm183_vm1, %v549_v2 }
 0x3cd   :  { %1072 = vmatmul.mubr.msk.f32.vlgmr.msra.gmra.mxu1 %vm183_vm1, %v551_v42  ;;  %v739_v4 = vpop.permute.xlu1 %738 }
 0x3ce   :  { %1119 = vpow2.f32 %v726_v3  ;;  %1082 = vmatpush3.msra.mxu1 %v741_v43 }
 0x3cf   :  { %1083 = vmatprep.subr.mxu1 %v739_v4 }
 0x3d0   :  { %1084 = vmatpush3.msra.mxu1 %v739_v4 }
 0x3d1   :  { %1088 = vmatprep.subr.mxu1 %v1356_v26 }
 0x3d9   :  { %v1118_v1 = vpop.eup %1117 }
 0x3da   :  { %v733_v5 = vsel %vm101_vm0, %v1118_v1, 0.0 }
 0x3db   :  { %v1120_v6 = vpop.eup %1119  ;;  %734 = vadd.xlane.f32.xlu1 %v733_v5 }
 0x3dc   :  { %1085 = vmatprep.mubr.msk.f32.mxu1 %vm101_vm0, %v1120_v6  ;;  %v730_v7 = vsel %vm101_vm0, %v1120_v6, 0.0 }
 0x3dd   :  { %731 = vadd.xlane.f32.xlu0 %v730_v7  ;;  %1086 = vmatmul.mubr.msk.f32.vlgmr.msra.gmra.mxu1 %vm101_vm0, %v1118_v1 }
 0x3de   :  { %1089 = vmatpush3.msra.mxu1 %v1356_v26 }
 0x3df   :  { %1090 = vmatprep.subr.mxu1 %v1358_v27 }
 0x3e0   :  { %1091 = vmatpush3.msra.mxu1 %v1358_v27 }
 0x3e1   :  { %1092 = vmatprep.subr.mxu1 %v1367_v28 }
 0x3e2   :  { %1093 = vmatpush3.msra.mxu1 %v1367_v28 }
 0x3e3   :  { %1094 = vmatprep.subr.mxu1 %v1371_v29 }
 0x3e4   :  { %1095 = vmatpush3.msra.mxu1 %v1371_v29 }
 0x464   :  { %v735_v9 = vpop.xlane.xlu1 %734 }
 0x466   :  { %v732_v8 = vpop.xlane.xlu0 %731 }
 0x467   :  { %1121 = vrcp.f32 %v732_v8 }
 0x468   :  { %1123 = vrcp.f32 %v735_v9 }
 0x474   :  { %v1122_v13 = vpop.eup %1121 }
 0x475   :  { %v1124_v15 = vpop.eup %1123 }
 0x48d   :  { %v1073_v10 = vpop.f32.mrf.mxu1 }
 0x48e   :  { %v913_v18 = vmul.f32 0.01, %v1073_v10  ;;  %vm911_vm6 = vcmp.gt.f32.partialorder %v1073_v10, 0.0 }
 0x48f   :  { %v622_v11 = vpop.f32.mrf.mxu1 }
 0x490   :  { %v912_v20 = vmul.f32 0.01, %v622_v11  ;;  %vm910_vm8 = vcmp.gt.f32.partialorder %v622_v11, 0.0  ;;  %v915_v23 = vsel %vm911_vm6, %v1073_v10, %v913_v18 }
 0x492   :  { %v914_v27 = vsel %vm910_vm8, %v622_v11, %v912_v20 }
 0x49d   :  { %v1087_v12 = vpop.f32.mrf.mxu1 }
 0x49e   :  { %v828_v17 = vmul.f32 %v1124_v15, %v1087_v12 }
 0x49f   :  { %v816_v14 = vpop.f32.mrf.mxu1 }
 0x4a0   :  { %v827_v16 = vmul.f32 %v1122_v13, %v816_v14 }
 0x4a2   :  { %1096 = vmatprep.mubr.msk.f32.mxu1 %vm183_vm1, %v827_v16 }
 0x4a3   :  { %1097 = vmatmul.mubr.msk.f32.vlgmr.msra.gmra.mxu1 %vm183_vm1, %v828_v17 }
 0x563   :  { %v1098_v19 = vpop.f32.mrf.mxu1 }
 0x564   :  { %vm917_vm7 = vcmp.gt.f32.partialorder %v1098_v19, 0.0  ;;  %v919_v21 = vmul.f32 0.01, %v1098_v19 }
 0x565   :  { %v901_v22 = vpop.f32.mrf.mxu1 }
 0x566   :  { %v921_v24 = vsel %vm917_vm7, %v1098_v19, %v919_v21  ;;  %vm916_vm9 = vcmp.gt.f32.partialorder %v901_v22, 0.0  ;;  %v918_v25 = vmul.f32 0.01, %v901_v22 }
 0x567   :  { %v923_v26 = vadd.f32 %v921_v24, %v915_v23 }
 0x568   :  { %v920_v28 = vsel %vm916_vm9, %v901_v22, %v918_v25 }
 0x569   :  { %v922_v29 = vadd.f32 %v920_v28, %v914_v27  ;;  %928 = vrot.lane.b32.xlu1 %v923_v26, %s1261_s4 }
 0x56b   :  { %926 = vrot.lane.b32.xlu0 %v922_v29, %s1261_s4 }
 0x5db   :  { %v929_v30 = vpop.permute.xlu1 %928 }
 0x5dc   :  { %934 = vst.msk [vmem:[#allocation11 + $0x8] sm:$0xff] %vm932_vm10, %v929_v30 }
 0x5dd   :  { %v927_v31 = vpop.permute.xlu0 %926 }
 0x5de   :  { %933 = vst.msk [vmem:[#allocation11] sm:$0xff] %vm932_vm10, %v927_v31 }
 0x5df   :  { %1236 = shalt.err (!%p1233_p1)
}
 0x5e0   :  { %946 = dma.vmem_to_hbm [thread:$0]  %s941_s18, 256, %s1418_s5, [#allocation4], %s1255_s23, %s1255_s23, %s1256_s24  }
 0x5e1   :  { %1251 = dma.done.wait [#allocation4], 256  }
 0x5e2   :  { %1252 = vsyncadd [#allocation4], 4294967040 }
 0x5e3   :  { %950 = vsyncpa [#allocation3], 1 }
 0x5e4   :  { %951 = vsyncpa [#allocation6], 1 }
 0x5e5   :  { %952 = vsyncpa [#allocation9], 1 }
 0x5e6   :  { %953 = vsyncpa [#allocation4], 1 }

// kernel: tpu_custom_call.1
= control target key start
LH: loop header
LB: loop body
LE: loop exit
PB: predicated region body
PF: predicated region fallthrough
CT: control target
= control target key end

     0   :  { %10 = vsyncpa [#allocation3], 0  ;;  %s1413_s0 = inlined_call_operand.hbm [shape: f32[16,16], index: 0, kind: input, shape index: {}]   ;;  %s1414_s1 = inlined_call_operand.hbm [shape: f32[32,32], index: 1, kind: input, shape index: {}]   ;;  %s1415_s2 = inlined_call_operand.hbm [shape: f32[32,32], index: 2, kind: input, shape index: {}]   ;;  %s1416_s3 = inlined_call_operand.hbm [shape: f32[16,64], index: 3, kind: input, shape index: {}]   ;;  %s1417_s4 = inlined_call_operand.hbm [shape: f32[16,64], index: 4, kind: input, shape index: {}]   ;;  %s1418_s5 = inlined_call_operand.hbm [shape: f32[16,64], index: 5, kind: output, shape index: {}]  }
   0x1   :  { %11 = vsyncpa [#allocation6], 0 }
   0x2   :  { %12 = vsyncpa [#allocation9], 0 }
   0x3   :  { %13 = vsyncpa [#allocation4], 0  ;;  %s1253_s18 = smov [#allocation5]   ;;  %s1254_s20 = smov [#allocation8]  }
   0x4   :  { %s31_s19 = sshll.u32 %s1253_s18, 4  ;;  %s55_s21 = sshll.u32 %s1254_s20, 4  ;;  %s32_s19 = int_to_ptr.vmem [resolvable:$true] %s31_s19  ;;  %s56_s21 = int_to_ptr.vmem [resolvable:$true] %s55_s21 }
   0x5   :  { %s1133_s22 = scalar_lea.vmem %s32_s19, 512  ;;  %p1138_p1 = scmp.lt.s32.totalorder %s32_s19, %s32_s19 }
   0x6   :  { %p1134_p0 = scmp.ne.s32.totalorder %s32_s19, %s1133_s22  ;;  %p1139_p2 = scmp.lt.s32.totalorder %s1133_s22, %s1133_s22 }
   0x8   :  { %p1140_p3 = por %p1139_p2, %p1138_p1 }
   0xa   :  { %p1141_p4 = pnand %p1140_p3, %p1134_p0 }
   0xc   :  { %1144 = shalt.err (!%p1141_p4)
}
   0xd   :  { %s1255_s23 = smov 128   ;;  %s1256_s24 = smov 8  }
   0xe   :  { %37 = dma.hbm_to_vmem [thread:$0]  %s1414_s1, 512, %s32_s19, [#allocation6], %s1255_s23, %s1255_s23, %s1256_s24  }
   0xf   :  { %s1153_s27 = scalar_lea.vmem %s56_s21, 256  ;;  %p1158_p6 = scmp.lt.s32.totalorder %s56_s21, %s56_s21 }
  0x10   :  { %p1154_p5 = scmp.ne.s32.totalorder %s56_s21, %s1153_s27  ;;  %p1159_p7 = scmp.lt.s32.totalorder %s1153_s27, %s1153_s27 }
  0x12   :  { %p1160_p8 = por %p1159_p7, %p1158_p6 }
  0x14   :  { %p1161_p9 = pnand %p1160_p8, %p1154_p5 }
  0x16   :  { %1164 = shalt.err (!%p1161_p9)
}
  0x17   :  { %61 = dma.hbm_to_vmem [thread:$0]  %s1416_s3, 256, %s56_s21, [#allocation9], %s1255_s23, %s1255_s23, %s1256_s24  }
  0x18   :  { %s1257_s30 = smov [#allocation2]   ;;  %s1258_s7 = smov [#allocation7]  }
  0x19   :  { %s19_s6 = sshll.u32 %s1257_s30, 4  ;;  %s43_s8 = sshll.u32 %s1258_s7, 4  ;;  %s20_s6 = int_to_ptr.vmem [resolvable:$true] %s19_s6  ;;  %s44_s8 = int_to_ptr.vmem [resolvable:$true] %s43_s8 }
  0x1a   :  { %s1173_s1 = scalar_lea.vmem %s20_s6, 256  ;;  %p1178_p11 = scmp.lt.s32.totalorder %s20_s6, %s20_s6 }
  0x1b   :  { %p1174_p10 = scmp.ne.s32.totalorder %s20_s6, %s1173_s1  ;;  %p1179_p12 = scmp.lt.s32.totalorder %s1173_s1, %s1173_s1 }
  0x1d   :  { %p1180_p13 = por %p1179_p12, %p1178_p11 }
  0x1f   :  { %p1181_p0 = pnand %p1180_p13, %p1174_p10 }
  0x21   :  { %1184 = shalt.err (!%p1181_p0)
}
  0x22   :  { %25 = dma.hbm_to_vmem [thread:$0]  %s1413_s0, 256, %s20_s6, [#allocation3], %s1255_s23, %s1255_s23, %s1256_s24  }
  0x23   :  { %s1193_s3 = scalar_lea.vmem %s44_s8, 512  ;;  %p1198_p2 = scmp.lt.s32.totalorder %s44_s8, %s44_s8 }
  0x24   :  { %p1194_p1 = scmp.ne.s32.totalorder %s44_s8, %s1193_s3  ;;  %p1199_p3 = scmp.lt.s32.totalorder %s1193_s3, %s1193_s3 }
  0x26   :  { %p1200_p4 = por %p1199_p3, %p1198_p2 }
  0x28   :  { %p1201_p5 = pnand %p1200_p4, %p1194_p1 }
  0x2a   :  { %1204 = shalt.err (!%p1201_p5)
}
  0x2b   :  { %49 = dma.hbm_to_vmem [thread:$0]  %s1415_s2, 512, %s44_s8, [#allocation6], %s1255_s23, %s1255_s23, %s1256_s24  }
  0x2c   :  { %s1259_s13 = smov [#allocation10]  }
  0x2d   :  { %s67_s14 = sshll.u32 %s1259_s13, 4  ;;  %s68_s14 = int_to_ptr.vmem [resolvable:$true] %s67_s14 }
  0x2e   :  { %s1213_s15 = scalar_lea.vmem %s68_s14, 256  ;;  %p1218_p7 = scmp.lt.s32.totalorder %s68_s14, %s68_s14 }
  0x2f   :  { %p1214_p6 = scmp.ne.s32.totalorder %s68_s14, %s1213_s15  ;;  %p1219_p8 = scmp.lt.s32.totalorder %s1213_s15, %s1213_s15 }
  0x31   :  { %p1220_p9 = por %p1219_p8, %p1218_p7 }
  0x33   :  { %p1221_p10 = pnand %p1220_p9, %p1214_p6 }
  0x35   :  { %1224 = shalt.err (!%p1221_p10)
}
  0x36   :  { %73 = dma.hbm_to_vmem [thread:$0]  %s1417_s4, 256, %s68_s14, [#allocation9], %s1255_s23, %s1255_s23, %s1256_s24  }
  0x37   :  { %1245 = dma.done.wait [#allocation3], 256  }
  0x38   :  { %1246 = vsyncadd [#allocation3], 4294967040 }
  0x39   :  { %1247 = dma.done.wait [#allocation6], 1024  }
  0x3a   :  { %1248 = vsyncadd [#allocation6], 4294966272 }
  0x3b   :  { %1249 = dma.done.wait [#allocation9], 512  }
  0x3c   :  { %1250 = vsyncadd [#allocation9], 4294966784  ;;  %vm101_vm0 = vcmask 130048   ;;  %v1323_v0 = vld [vmem:[#allocation8 + $0x8] sm:$0xff]  ;;  %v1325_v1 = vld [vmem:[#allocation8] sm:$0xff]  ;;  %vm183_vm1 = vcmask 261120  }
  0x3d   :  { %v89_v2 = vld [vmem:[#allocation2] sm:$0xff]  ;;  %1020 = vmatprep.subr.mxu0 %v1323_v0  ;;  %v90_v3 = vld [vmem:[#allocation2 + $0x8] sm:$0xff]  ;;  %v92_v8 = vld [vmem:[#allocation5 + $0x8] sm:$0xff]  ;;  %s1260_s2 = smov 96   ;;  %s1261_s4 = smov 32   ;;  %vm932_vm10 = vcmask 523520  }
  0x3e   :  { %1024 = vmatprep.mubr.msk.f32.mxu0 %vm101_vm0, %v89_v2  ;;  %1021 = vmatpush3.msra.mxu0 %v1323_v0  ;;  %v266_v4 = vld [vmem:[#allocation10 + $0x8] sm:$0xff]  ;;  %v265_v6 = vld [vmem:[#allocation10] sm:$0xff]  ;;  %v91_v9 = vld [vmem:[#allocation5] sm:$0xff]  ;;  %s1262_s17 = smov [#allocation11]  }
  0x3f   :  { %v94_v5 = vld [vmem:[#allocation5 + $0x18] sm:$0xff]  ;;  %1022 = vmatprep.subr.mxu0 %v1325_v1  ;;  %v93_v7 = vld [vmem:[#allocation5 + $0x10] sm:$0xff]  ;;  %v1367_v28 = vld [vmem:[#allocation7 + $0x8] sm:$0xff]  ;;  %s940_s18 = sshll.u32 %s1262_s17, 4  ;;  %s941_s18 = int_to_ptr.vmem [resolvable:$true] %s940_s18 }
  0x40   :  { %1027 = vmatprep.subr.mxu1 %v94_v5  ;;  %1023 = vmatpush3.msra.mxu0 %v1325_v1  ;;  %v1356_v26 = vld [vmem:[#allocation7 + $0x18] sm:$0xff]  ;;  %v1358_v27 = vld [vmem:[#allocation7 + $0x10] sm:$0xff]  ;;  %v1371_v29 = vld [vmem:[#allocation7] sm:$0xff]  ;;  %s1225_s19 = scalar_lea.vmem %s941_s18, 256  ;;  %p1230_p12 = scmp.lt.s32.totalorder %s941_s18, %s941_s18 }
  0x41   :  { %1028 = vmatpush3.msra.mxu1 %v94_v5  ;;  %1025 = vmatmul.mubr.msk.f32.vlgmr.msra.gmra.mxu0 %vm101_vm0, %v90_v3  ;;  %p1226_p11 = scmp.ne.s32.totalorder %s941_s18, %s1225_s19  ;;  %p1231_p13 = scmp.lt.s32.totalorder %s1225_s19, %s1225_s19 }
  0x42   :  { %1038 = vmatprep.subr.msk.mxu0 %vm183_vm1, %v266_v4  ;;  %1042 = vmatprep.mubr.msk.f32.mxu0 %vm183_vm1, %v265_v6 }
  0x43   :  { %1039 = vmatpush3.xpose.msk.msra.mxu0 %vm183_vm1, %v266_v4  ;;  %1029 = vmatprep.subr.mxu1 %v93_v7  ;;  %p1232_p0 = por %p1231_p13, %p1230_p12 }
  0x44   :  { %1040 = vmatprep.subr.msk.mxu0 %vm183_vm1, %v265_v6  ;;  %1030 = vmatpush3.msra.mxu1 %v93_v7 }
  0x45   :  { %1031 = vmatprep.subr.mxu1 %v92_v8  ;;  %p1233_p1 = pnand %p1232_p0, %p1226_p11 }
  0x46   :  { %1032 = vmatpush3.msra.mxu1 %v92_v8 }
  0x47   :  { %1041 = vmatpush3.xpose.msk.msra.mxu0 %vm183_vm1, %v265_v6  ;;  %1033 = vmatprep.subr.mxu1 %v91_v9 }
  0x48   :  { %1034 = vmatpush3.msra.mxu1 %v91_v9  ;;  %1052 = vmatprep.subr.mxu0 %v1356_v26 }
  0x49   :  { %1045 = vmatprep.subr.mxu1 %v1323_v0 }
  0x4a   :  { %1043 = vmatmul.mubr.msk.f32.vlgmr.msra.gmra.mxu0 %vm183_vm1, %v266_v4 }
  0x4b   :  { %1053 = vmatpush3.msra.mxu0 %v1356_v26 }
  0x4c   :  { %1054 = vmatprep.subr.mxu0 %v1358_v27 }
  0x4d   :  { %1055 = vmatpush3.msra.mxu0 %v1358_v27 }
  0x4e   :  { %1056 = vmatprep.subr.mxu0 %v1367_v28 }
  0x4f   :  { %1057 = vmatpush3.msra.mxu0 %v1367_v28 }
  0x50   :  { %1058 = vmatprep.subr.mxu0 %v1371_v29 }
  0x51   :  { %1059 = vmatpush3.msra.mxu0 %v1371_v29 }
 0x101   :  { %v1026_v10 = vpop.f32.mrf.mxu0 }
 0x103   :  { %v1340_v11 = vpop.f32.mrf.mxu0 }
 0x104   :  { %1035 = vmatprep.mubr.msk.f32.mxu1 %vm183_vm1, %v1340_v11 }
 0x105   :  { %1036 = vmatmul.mubr.msk.f32.vlgmr.msra.gmra.mxu1 %vm183_vm1, %v1026_v10 }
 0x106   :  { %1046 = vmatpush3.msra.mxu1 %v1323_v0 }
 0x107   :  { %1047 = vmatprep.subr.mxu1 %v1325_v1 }
 0x108   :  { %1048 = vmatpush3.msra.mxu1 %v1325_v1 }
 0x109   :  { %1063 = vmatprep.subr.mxu1 %v94_v5 }
 0x10a   :  { %v1044_v12 = vpop.f32.mrf.mxu0 }
 0x10b   :  { %v351_v15 = vsel %vm101_vm0, %v1044_v12, -inf }
 0x10c   :  { %v339_v13 = vpop.f32.mrf.mxu0 }
 0x10d   :  { %v348_v14 = vsel %vm101_vm0, %v339_v13, -inf }
 0x10e   :  { %349 = vmax.xlane.f32.xlu0 %v348_v14 }
 0x112   :  { %352 = vmax.xlane.f32.xlu0 %v351_v15 }
 0x128   :  { %637 = vrot.lane.b32.xlu0 %v266_v4, %s1260_s2 }
 0x197   :  { %v350_v16 = vpop.xlane.xlu0 %349 }
 0x198   :  { %v354_v17 = vsub.f32 %v339_v13, %v350_v16 }
 0x19a   :  { %v356_v18 = vmul.f32 1.442695, %v354_v17 }
 0x19b   :  { %v353_v19 = vpop.xlane.xlu0 %352 }
 0x19c   :  { %1109 = vpow2.f32 %v356_v18  ;;  %v355_v20 = vsub.f32 %v1044_v12, %v353_v19 }
 0x19e   :  { %v358_v21 = vmul.f32 1.442695, %v355_v20 }
 0x19f   :  { %v638_v30 = vpop.permute.xlu0 %637 }
 0x1a0   :  { %1111 = vpow2.f32 %v358_v21  ;;  %1074 = vmatprep.subr.msk.mxu0 %vm183_vm1, %v638_v30 }
 0x1a9   :  { %v1110_v22 = vpop.eup %1109 }
 0x1aa   :  { %1049 = vmatprep.mubr.msk.f32.mxu1 %vm101_vm0, %v1110_v22  ;;  %v360_v25 = vsel %vm101_vm0, %v1110_v22, 0.0 }
 0x1ad   :  { %v1112_v23 = vpop.eup %1111 }
 0x1ae   :  { %1050 = vmatmul.mubr.msk.f32.vlgmr.msra.gmra.mxu1 %vm101_vm0, %v1112_v23  ;;  %v363_v24 = vsel %vm101_vm0, %v1112_v23, 0.0 }
 0x1af   :  { %364 = vadd.xlane.f32.xlu1 %v363_v24  ;;  %1064 = vmatpush3.msra.mxu1 %v94_v5 }
 0x1b0   :  { %1065 = vmatprep.subr.mxu1 %v93_v7 }
 0x1b1   :  { %1066 = vmatpush3.msra.mxu1 %v93_v7 }
 0x1b2   :  { %1067 = vmatprep.subr.mxu1 %v92_v8 }
 0x1b3   :  { %361 = vadd.xlane.f32.xlu1 %v360_v25  ;;  %1068 = vmatpush3.msra.mxu1 %v92_v8 }
 0x1b4   :  { %1069 = vmatprep.subr.mxu1 %v91_v9 }
 0x1b5   :  { %1070 = vmatpush3.msra.mxu1 %v91_v9 }
 0x1c4   :  { %635 = vrot.lane.b32.xlu1 %v265_v6, %s1260_s2 }
 0x1c5   :  { %v1037_v33 = vpop.f32.mrf.mxu1 }
 0x1c6   :  { %v535_v44 = vmul.f32 0.01, %v1037_v33  ;;  %vm533_vm2 = vcmp.gt.f32.partialorder %v1037_v33, 0.0 }
 0x1c7   :  { %v256_v34 = vpop.f32.mrf.mxu1 }
 0x1c8   :  { %550 = vrot.lane.b32.xlu1 %v1026_v10, %s1260_s2  ;;  %v534_v46 = vmul.f32 0.01, %v256_v34  ;;  %vm532_vm4 = vcmp.gt.f32.partialorder %v256_v34, 0.0  ;;  %v537_v49 = vsel %vm533_vm2, %v1037_v33, %v535_v44 }
 0x1ca   :  { %v536_v53 = vsel %vm532_vm4, %v256_v34, %v534_v46 }
 0x1cc   :  { %740 = vrot.lane.b32.xlu1 %v1323_v0, %s1260_s2 }
 0x238   :  { %v365_v31 = vpop.xlane.xlu1 %364 }
 0x23c   :  { %v362_v32 = vpop.xlane.xlu1 %361 }
 0x23d   :  { %1113 = vrcp.f32 %v362_v32 }
 0x23e   :  { %1115 = vrcp.f32 %v365_v31 }
 0x240   :  { %v636_v41 = vpop.permute.xlu1 %635 }
 0x244   :  { %v551_v42 = vpop.permute.xlu1 %550 }
 0x248   :  { %v741_v43 = vpop.permute.xlu1 %740 }
 0x249   :  { %1081 = vmatprep.subr.mxu1 %v741_v43 }
 0x24a   :  { %v1114_v36 = vpop.eup %1113 }
 0x24b   :  { %v1116_v38 = vpop.eup %1115 }
 0x26e   :  { %v1051_v35 = vpop.f32.mrf.mxu1 }
 0x26f   :  { %v450_v40 = vmul.f32 %v1116_v38, %v1051_v35 }
 0x270   :  { %v438_v37 = vpop.f32.mrf.mxu1 }
 0x271   :  { %v449_v39 = vmul.f32 %v1114_v36, %v438_v37 }
 0x273   :  { %1060 = vmatprep.mubr.msk.f32.mxu0 %vm183_vm1, %v449_v39 }
 0x274   :  { %1061 = vmatmul.mubr.msk.f32.vlgmr.msra.gmra.mxu0 %vm183_vm1, %v450_v40 }
 0x275   :  { %1075 = vmatpush3.xpose.msk.msra.mxu0 %vm183_vm1, %v638_v30  ;;  %1078 = vmatprep.mubr.msk.f32.mxu0 %vm183_vm1, %v636_v41 }
 0x276   :  { %1076 = vmatprep.subr.msk.mxu0 %vm183_vm1, %v636_v41 }
 0x279   :  { %1077 = vmatpush3.xpose.msk.msra.mxu0 %vm183_vm1, %v636_v41 }
 0x27c   :  { %1079 = vmatmul.mubr.msk.f32.vlgmr.msra.gmra.mxu0 %vm183_vm1, %v638_v30 }
 0x334   :  { %v1062_v45 = vpop.f32.mrf.mxu0 }
 0x335   :  { %vm539_vm3 = vcmp.gt.f32.partialorder %v1062_v45, 0.0  ;;  %v541_v47 = vmul.f32 0.01, %v1062_v45 }
 0x336   :  { %v523_v48 = vpop.f32.mrf.mxu0 }
 0x337   :  { %v543_v50 = vsel %vm539_vm3, %v1062_v45, %v541_v47  ;;  %vm538_vm5 = vcmp.gt.f32.partialorder %v523_v48, 0.0  ;;  %v540_v51 = vmul.f32 0.01, %v523_v48 }
 0x338   :  { %v545_v52 = vadd.f32 %v543_v50, %v537_v49 }
 0x339   :  { %v542_v54 = vsel %vm538_vm5, %v523_v48, %v540_v51 }
 0x33a   :  { %547 = vst.msk [vmem:[#allocation11 + $0x8] sm:$0xff] %vm183_vm1, %v545_v52  ;;  %v544_v55 = vadd.f32 %v542_v54, %v536_v53 }
 0x33c   :  { %546 = vst.msk [vmem:[#allocation11] sm:$0xff] %vm183_vm1, %v544_v55  ;;  %v1080_v56 = vpop.f32.mrf.mxu0 }
 0x33d   :  { %v721_v57 = vsel %vm101_vm0, %v1080_v56, -inf }
 0x33e   :  { %722 = vmax.xlane.f32.xlu0 %v721_v57  ;;  %v709_v58 = vpop.f32.mrf.mxu0 }
 0x33f   :  { %v718_v59 = vsel %vm101_vm0, %v709_v58, -inf }
 0x340   :  { %719 = vmax.xlane.f32.xlu1 %v718_v59 }
 0x351   :  { %738 = vrot.lane.b32.xlu1 %v1325_v1, %s1260_s2 }
 0x354   :  { %548 = vrot.lane.b32.xlu0 %v1340_v11, %s1260_s2 }
 0x3c7   :  { %v723_v60 = vpop.xlane.xlu0 %722 }
 0x3c8   :  { %v725_v61 = vsub.f32 %v1080_v56, %v723_v60 }
 0x3c9   :  { %v720_v62 = vpop.xlane.xlu1 %719 }
 0x3ca   :  { %v728_v63 = vmul.f32 1.442695, %v725_v61  ;;  %v724_v0 = vsub.f32 %v709_v58, %v720_v62 }
 0x3cb   :  { %v549_v2 = vpop.permute.xlu0 %548 }
 0x3cc   :  { %1117 = vpow2.f32 %v728_v63  ;;  %v726_v3 = vmul.f32 1.442695, %v724_v0  ;;  %1071 = vmatprep.mubr.msk.f32.mxu1 %vm183_vm1, %v549_v2 }
 0x3cd   :  { %1072 = vmatmul.mubr.msk.f32.vlgmr.msra.gmra.mxu1 %vm183_vm1, %v551_v42  ;;  %v739_v4 = vpop.permute.xlu1 %738 }
 0x3ce   :  { %1119 = vpow2.f32 %v726_v3  ;;  %1082 = vmatpush3.msra.mxu1 %v741_v43 }
 0x3cf   :  { %1083 = vmatprep.subr.mxu1 %v739_v4 }
 0x3d0   :  { %1084 = vmatpush3.msra.mxu1 %v739_v4 }
 0x3d1   :  { %1088 = vmatprep.subr.mxu1 %v1356_v26 }
 0x3d9   :  { %v1118_v1 = vpop.eup %1117 }
 0x3da   :  { %v733_v5 = vsel %vm101_vm0, %v1118_v1, 0.0 }
 0x3db   :  { %v1120_v6 = vpop.eup %1119  ;;  %734 = vadd.xlane.f32.xlu1 %v733_v5 }
 0x3dc   :  { %1085 = vmatprep.mubr.msk.f32.mxu1 %vm101_vm0, %v1120_v6  ;;  %v730_v7 = vsel %vm101_vm0, %v1120_v6, 0.0 }
 0x3dd   :  { %731 = vadd.xlane.f32.xlu0 %v730_v7  ;;  %1086 = vmatmul.mubr.msk.f32.vlgmr.msra.gmra.mxu1 %vm101_vm0, %v1118_v1 }
 0x3de   :  { %1089 = vmatpush3.msra.mxu1 %v1356_v26 }
 0x3df   :  { %1090 = vmatprep.subr.mxu1 %v1358_v27 }
 0x3e0   :  { %1091 = vmatpush3.msra.mxu1 %v1358_v27 }
 0x3e1   :  { %1092 = vmatprep.subr.mxu1 %v1367_v28 }
 0x3e2   :  { %1093 = vmatpush3.msra.mxu1 %v1367_v28 }
 0x3e3   :  { %1094 = vmatprep.subr.mxu1 %v1371_v29 }
 0x3e4   :  { %1095 = vmatpush3.msra.mxu1 %v1371_v29 }
 0x464   :  { %v735_v9 = vpop.xlane.xlu1 %734 }
 0x466   :  { %v732_v8 = vpop.xlane.xlu0 %731 }
 0x467   :  { %1121 = vrcp.f32 %v732_v8 }
 0x468   :  { %1123 = vrcp.f32 %v735_v9 }
 0x474   :  { %v1122_v13 = vpop.eup %1121 }
 0x475   :  { %v1124_v15 = vpop.eup %1123 }
 0x48d   :  { %v1073_v10 = vpop.f32.mrf.mxu1 }
 0x48e   :  { %v913_v18 = vmul.f32 0.01, %v1073_v10  ;;  %vm911_vm6 = vcmp.gt.f32.partialorder %v1073_v10, 0.0 }
 0x48f   :  { %v622_v11 = vpop.f32.mrf.mxu1 }
 0x490   :  { %v912_v20 = vmul.f32 0.01, %v622_v11  ;;  %vm910_vm8 = vcmp.gt.f32.partialorder %v622_v11, 0.0  ;;  %v915_v23 = vsel %vm911_vm6, %v1073_v10, %v913_v18 }
 0x492   :  { %v914_v27 = vsel %vm910_vm8, %v622_v11, %v912_v20 }
 0x49d   :  { %v1087_v12 = vpop.f32.mrf.mxu1 }
 0x49e   :  { %v828_v17 = vmul.f32 %v1124_v15, %v1087_v12 }
 0x49f   :  { %v816_v14 = vpop.f32.mrf.mxu1 }
 0x4a0   :  { %v827_v16 = vmul.f32 %v1122_v13, %v816_v14 }
 0x4a2   :  { %1096 = vmatprep.mubr.msk.f32.mxu1 %vm183_vm1, %v827_v16 }
 0x4a3   :  { %1097 = vmatmul.mubr.msk.f32.vlgmr.msra.gmra.mxu1 %vm183_vm1, %v828_v17 }
 0x563   :  { %v1098_v19 = vpop.f32.mrf.mxu1 }
 0x564   :  { %vm917_vm7 = vcmp.gt.f32.partialorder %v1098_v19, 0.0  ;;  %v919_v21 = vmul.f32 0.01, %v1098_v19 }
 0x565   :  { %v901_v22 = vpop.f32.mrf.mxu1 }
 0x566   :  { %v921_v24 = vsel %vm917_vm7, %v1098_v19, %v919_v21  ;;  %vm916_vm9 = vcmp.gt.f32.partialorder %v901_v22, 0.0  ;;  %v918_v25 = vmul.f32 0.01, %v901_v22 }
 0x567   :  { %v923_v26 = vadd.f32 %v921_v24, %v915_v23 }
 0x568   :  { %v920_v28 = vsel %vm916_vm9, %v901_v22, %v918_v25 }
 0x569   :  { %v922_v29 = vadd.f32 %v920_v28, %v914_v27  ;;  %928 = vrot.lane.b32.xlu1 %v923_v26, %s1261_s4 }
 0x56b   :  { %926 = vrot.lane.b32.xlu0 %v922_v29, %s1261_s4 }
 0x5db   :  { %v929_v30 = vpop.permute.xlu1 %928 }
 0x5dc   :  { %934 = vst.msk [vmem:[#allocation11 + $0x8] sm:$0xff] %vm932_vm10, %v929_v30 }
 0x5dd   :  { %v927_v31 = vpop.permute.xlu0 %926 }
 0x5de   :  { %933 = vst.msk [vmem:[#allocation11] sm:$0xff] %vm932_vm10, %v927_v31 }
 0x5df   :  { %1236 = shalt.err (!%p1233_p1)
}
 0x5e0   :  { %946 = dma.vmem_to_hbm [thread:$0]  %s941_s18, 256, %s1418_s5, [#allocation4], %s1255_s23, %s1255_s23, %s1256_s24  }
 0x5e1   :  { %1251 = dma.done.wait [#allocation4], 256  }
 0x5e2   :  { %1252 = vsyncadd [#allocation4], 4294967040 }
 0x5e3   :  { %950 = vsyncpa [#allocation3], 1 }
 0x5e4   :  { %951 = vsyncpa [#allocation6], 1 }
 0x5e5   :  { %952 = vsyncpa [#allocation9], 1 }
 0x5e6   :  { %953 = vsyncpa [#allocation4], 1 }

</bundles_post_ra>
